<compile_context>
chip_gen: v5e
topology: v5e:2x2
jax: 0.10.0
libtpu: 0.0.40
codegen_flags: <defaults>
</compile_context>

<pallas_src>
import functools

import jax
import jax.numpy as jnp
from jax import lax
from jax.experimental import pallas as pl
from jax.experimental.pallas import tpu as pltpu

LANE = 128
SUBLANE = 8


def _sublane_packing(dtype) -> int:
    """Sublane multiple needed for a clean packed tile of `dtype`."""
    itemsize = jnp.dtype(dtype).itemsize
    return SUBLANE * max(1, 4 // max(1, itemsize))  # f32->8, bf16->16, i8/bool->32


def _make_focal_kernel(total, block_rows, inner_steps, gamma, alpha):
    alpha = float(alpha)
    block_elems = block_rows * LANE
    gamma_is_int = float(gamma) == int(gamma)
    gamma_int, gamma_f = int(gamma), float(gamma)

    def _pow(v):
        # Integer gamma -> VPU multiplies; float gamma -> fallback pow
        # (bases are always >= 0 with the two-where formulation below).
        if gamma_is_int:
            if gamma_int == 0:
                return jnp.ones_like(v)
            return lax.integer_pow(v, gamma_int)
        return v ** gamma_f

    def _fold(v):
        # (block_rows, LANE) -> (8, LANE) using pure vreg-aligned VALU adds
        # (no per-step cross-sublane XLU reduce).
        return v.reshape(block_rows // SUBLANE, SUBLANE, LANE).sum(axis=0)

    def kernel(x_ref, t_ref, o_ref, acc_ref):
        c = pl.program_id(0)   # split axis ("parallel"; one shard per TC on v7x)
        i = pl.program_id(1)   # streaming axis ("arbitrary")

        @pl.when(i == 0)
        def _init():
            acc_ref[...] = jnp.zeros_like(acc_ref)

        x = x_ref[...].astype(jnp.float32)
        t = t_ref[...].astype(jnp.float32)

        # Numerically-stable, shared-transcendental formulation:
        #   e = exp(-|x|)
        #   log(sigmoid(x))     = min(x, 0)  - log1p(e)
        #   log(1 - sigmoid(x)) = min(-x, 0) - log1p(e)
        #   sigmoid(x)          = 1/(1+e) if x >= 0 else e/(1+e)
        e = jnp.exp(-jnp.abs(x))
        log1pe = jnp.log1p(e)
        log_pt = jnp.minimum(x, 0.0) - log1pe
        log_one_m_pt = jnp.minimum(-x, 0.0) - log1pe
        inv = pl.reciprocal(1.0 + e, approx=True)   # EUP rcp, no Newton refine
        e_inv = e * inv
        pos = x >= 0.0
        pt = jnp.where(pos, inv, e_inv)
        one_m_pt = jnp.where(pos, e_inv, inv)       # never negative (robust vs 1-pt)

        loss = (-alpha * _pow(one_m_pt) * t * log_pt
                - (1.0 - alpha) * _pow(pt) * (1.0 - t) * log_one_m_pt)

        # Valid element count for this block.  `total`, `inner_steps` and
        # `block_elems` are Python constants; <= 0 for split-padding blocks.
        g = c * inner_steps + i
        valid = total - g * block_elems

        @pl.when(valid >= block_elems)
        def _acc_full():
            acc_ref[...] += _fold(loss)

        @pl.when(valid < block_elems)
        def _acc_tail():
            row = lax.broadcasted_iota(jnp.int32, (block_rows, LANE), 0)
            lane = lax.broadcasted_iota(jnp.int32, (block_rows, LANE), 1)
            keep = (row * LANE + lane) < valid
            acc_ref[...] += _fold(jnp.where(keep, loss, 0.0))

        @pl.when(i == inner_steps - 1)
        def _finalize():
            o_ref[0] = acc_ref[...]   # lane-dense (8, 128) partial per split

    return kernel


@functools.partial(jax.jit, static_argnames=("gamma", "alpha", "reduction",
                                             "block_rows"))
def bce_focal_loss(_input, target, *, gamma=2, alpha=0.9,
                   reduction="elementwise_mean", block_rows=2048):
    """Pallas-TPU equivalent of BCEFocalLoss.forward (mean / sum reductions).

    `target` may be bf16 / int8 / bool; do NOT pre-cast to f32 (the kernel
    upcasts in VMEM, and smaller target dtypes cut streamed HBM bytes).
    """
    assert reduction in ("elementwise_mean", "sum")
    # TODO(synk): reduction='none' (elementwise output) not wired up; the
    # reference module defaults to 'elementwise_mean'.

    total = int(_input.size)
    if total == 0:
        return jnp.float32(0.0) if reduction == "sum" else jnp.float32(jnp.nan)

    sub = max(_sublane_packing(_input.dtype), _sublane_packing(target.dtype))

    rows = pl.cdiv(total, LANE)
    rows_p = max(rows, sub)            # tiny inputs: at least one packed tile
    padded = rows_p * LANE
    pad = padded - total

    xf = _input.reshape(-1)
    tf = target.reshape(-1)
    if pad:
        # Only non-lane-aligned totals (or tiny inputs) pay this; padded
        # elements are masked out in-kernel so any constant works.
        # TODO(synk): a non-multiple-of-128 total still costs one copy pass
        # here; avoiding it needs a manual-DMA tail path, not worth it.
        xf = jnp.pad(xf, (0, pad))
        tf = jnp.pad(tf, (0, pad))
    xf = xf.reshape(rows_p, LANE)
    tf = tf.reshape(rows_p, LANE)

    block_rows = max(sub, (int(block_rows) // sub) * sub)
    block_rows_eff = min(block_rows, (rows_p // sub) * sub)
    grid_rows = pl.cdiv(rows_p, block_rows_eff)

    # Megacore: split the row-block range across a leading "parallel" axis.
    num_splits = 2 if grid_rows >= 2 else 1
    inner = pl.cdiv(grid_rows, num_splits)
    last_block = grid_rows - 1

    kernel = _make_focal_kernel(total, block_rows_eff, inner, gamma, alpha)

    def in_map(c, i):
        # Clamp overflow blocks of the split padding back in range; their
        # (duplicate) data contributes zero via the in-kernel mask.
        return (jnp.minimum(c * inner + i, last_block), 0)

    out = pl.pallas_call(
        kernel,
        out_shape=jax.ShapeDtypeStruct((num_splits, SUBLANE, LANE), jnp.float32),
        grid_spec=pltpu.PrefetchScalarGridSpec(
            num_scalar_prefetch=0,
            grid=(num_splits, inner),
            in_specs=[
                pl.BlockSpec((block_rows_eff, LANE), in_map),
                pl.BlockSpec((block_rows_eff, LANE), in_map),
            ],
            out_specs=pl.BlockSpec((1, SUBLANE, LANE), lambda c, i: (c, 0, 0)),
            scratch_shapes=[pltpu.VMEM((SUBLANE, LANE), jnp.float32)],
        ),
        compiler_params=pltpu.CompilerParams(
            dimension_semantics=("parallel", "arbitrary"),
            vmem_limit_bytes=32 * 1024 * 1024,
        ),
    )(xf, tf)

    result = jnp.sum(out)                       # tiny (splits, 8, 128) combine
    if reduction == "elementwise_mean":
        result = result * (1.0 / total)         # precomputed reciprocal
    return result


def _reference(x, t, gamma=2, alpha=0.9, reduction="elementwise_mean"):
    x = x.astype(jnp.float32)
    t = t.astype(jnp.float32)
    pt = jax.nn.sigmoid(x)
    loss = (-alpha * (1.0 - pt) ** gamma * t * jnp.log(pt)
            - (1.0 - alpha) * pt ** gamma * (1.0 - t) * jnp.log(1.0 - pt))
    if reduction == "elementwise_mean":
        return jnp.mean(loss)
    return jnp.sum(loss)


if __name__ == "__main__":
    key = jax.random.PRNGKey(0)
    kx, kt, kx2, kt2, kx3, kt3, kx4, kt4 = jax.random.split(key, 8)

    # Approx reciprocal (~2^-12 rel err on the focal weights) -> relaxed rtol.
    RTOL, ATOL = 2e-3, 1e-5

    # NCHW logits and binary targets, as the BCE focal loss expects.
    x = jax.random.normal(kx, (2, 4, 16, 16), dtype=jnp.float32)
    target = jax.random.bernoulli(kt, p=0.3, shape=(2, 4, 16, 16)).astype(
        jnp.float32)
    out = jax.block_until_ready(bce_focal_loss(x, target))
    ref = _reference(x, target)
    assert jnp.allclose(out, ref, rtol=RTOL, atol=ATOL), (out, ref)

    # 'sum' reduction path.
    out_sum = jax.block_until_ready(bce_focal_loss(x, target, reduction="sum"))
    ref_sum = _reference(x, target, reduction="sum")
    assert jnp.allclose(out_sum, ref_sum, rtol=RTOL, atol=1e-3), (out_sum,
                                                                  ref_sum)

    # Ragged shape (not a multiple of 128) -> tiny pad + in-kernel mask.
    x2 = jax.random.normal(kx2, (3, 5, 7), dtype=jnp.float32)
    t2 = jax.random.bernoulli(kt2, p=0.5, shape=(3, 5, 7)).astype(jnp.float32)
    out2 = jax.block_until_ready(bce_focal_loss(x2, t2))
    ref2 = _reference(x2, t2)
    assert jnp.allclose(out2, ref2, rtol=RTOL, atol=ATOL), (out2, ref2)

    # Multi-block + two-way split, partial last block, bf16 targets.
    x3 = jax.random.normal(kx3, (4, 4, 128, 129), dtype=jnp.float32)
    t3 = jax.random.bernoulli(kt3, p=0.4, shape=(4, 4, 128, 129)).astype(
        jnp.bfloat16)
    out3 = jax.block_until_ready(bce_focal_loss(x3, t3))
    ref3 = _reference(x3, t3)
    assert jnp.allclose(out3, ref3, rtol=RTOL, atol=ATOL), (out3, ref3)

    # Odd number of blocks -> one fully-out-of-range (clamped + masked) block.
    x4 = jax.random.normal(kx4, (768, 1024), dtype=jnp.float32)
    t4 = jax.random.bernoulli(kt4, p=0.2, shape=(768, 1024)).astype(jnp.float32)
    out4 = jax.block_until_ready(bce_focal_loss(x4, t4))
    ref4 = _reference(x4, t4)
    assert jnp.allclose(out4, ref4, rtol=RTOL, atol=ATOL), (out4, ref4)

    print("KERNEL_OK")
</pallas_src>

<mosaic_0001>
module attributes {stable_mosaic.version = 11 : i64} {
  func.func @kernel(%arg0: i32, %arg1: i32, %arg2: memref<16x128xf32, #tpu.memory_space<vmem>>, %arg3: memref<16x128xf32, #tpu.memory_space<vmem>>, %arg4: memref<1x8x128xf32, #tpu.memory_space<vmem>>, %arg5: memref<8x128xf32, #tpu.memory_space<vmem>>) attributes {dimension_semantics = [#tpu.dimension_semantics<parallel>, #tpu.dimension_semantics<arbitrary>], iteration_bounds = array<i64: 1, 1>, scalar_prefetch = 0 : i64, scratch_operands = 1 : i64, tpu.core_type = #tpu.core_type<tc>, window_params = [{transform_indices = @transform_0, window_bounds = array<i64: 16, 128>}, {transform_indices = @transform_1, window_bounds = array<i64: 16, 128>}, {transform_indices = @transform_2, window_bounds = array<i64: 1, 8, 128>}]} {
    %c0_i32 = arith.constant 0 : i32
    %0 = arith.cmpi eq, %arg1, %c0_i32 : i32
    %1 = arith.extui %0 : i1 to i32
    %c0_i32_0 = arith.constant 0 : i32
    %2 = arith.cmpi ne, %1, %c0_i32_0 : i32
    scf.if %2 {
      %cst_19 = arith.constant 0.000000e+00 : f32
      %52 = vector.broadcast %cst_19 : f32 to vector<8x128xf32>
      %c0_20 = arith.constant 0 : index
      %c0_21 = arith.constant 0 : index
      %53 = vector.load %arg5[%c0_20, %c0_21] : memref<8x128xf32, #tpu.memory_space<vmem>>, vector<8x128xf32>
      tpu.vector_store %arg5[%c0_20, %c0_21], %52 {strides = array<i32>} : memref<8x128xf32, #tpu.memory_space<vmem>>, vector<8x128xf32>,
    } else {
    }
    %c0 = arith.constant 0 : index
    %c0_1 = arith.constant 0 : index
    %3 = vector.load %arg2[%c0, %c0_1] : memref<16x128xf32, #tpu.memory_space<vmem>>, vector<16x128xf32>
    %c0_2 = arith.constant 0 : index
    %c0_3 = arith.constant 0 : index
    %4 = vector.load %arg3[%c0_2, %c0_3] : memref<16x128xf32, #tpu.memory_space<vmem>>, vector<16x128xf32>
    %5 = math.absf %3 : vector<16x128xf32>
    %cst = arith.constant 0.000000e+00 : f32
    %6 = vector.broadcast %cst : f32 to vector<16x128xf32>
    %7 = arith.subf %6, %5 : vector<16x128xf32>
    %8 = math.exp %7 : vector<16x128xf32>
    %9 = math.log1p %8 : vector<16x128xf32>
    %cst_4 = arith.constant 0.000000e+00 : f32
    %10 = vector.broadcast %cst_4 : f32 to vector<16x128xf32>
    %11 = arith.minimumf %3, %10 : vector<16x128xf32>
    %12 = arith.subf %11, %9 : vector<16x128xf32>
    %cst_5 = arith.constant 0.000000e+00 : f32
    %13 = vector.broadcast %cst_5 : f32 to vector<16x128xf32>
    %14 = arith.subf %13, %3 : vector<16x128xf32>
    %cst_6 = arith.constant 0.000000e+00 : f32
    %15 = vector.broadcast %cst_6 : f32 to vector<16x128xf32>
    %16 = arith.minimumf %14, %15 : vector<16x128xf32>
    %17 = arith.subf %16, %9 : vector<16x128xf32>
    %cst_7 = arith.constant 1.000000e+00 : f32
    %18 = vector.broadcast %cst_7 : f32 to vector<16x128xf32>
    %19 = arith.addf %18, %8 : vector<16x128xf32>
    %20 = tpu.reciprocal %19 {approx = true} : vector<16x128xf32> -> vector<16x128xf32>
    %21 = arith.mulf %8, %20 : vector<16x128xf32>
    %cst_8 = arith.constant 0.000000e+00 : f32
    %22 = vector.broadcast %cst_8 : f32 to vector<16x128xf32>
    %23 = arith.cmpf oge, %3, %22 : vector<16x128xf32>
    %24 = arith.select %23, %20, %21 : vector<16x128xi1>, vector<16x128xf32>
    %25 = arith.select %23, %21, %20 : vector<16x128xi1>, vector<16x128xf32>
    %26 = arith.mulf %25, %25 : vector<16x128xf32>
    %cst_9 = arith.constant -0.899999976 : f32
    %27 = vector.broadcast %cst_9 : f32 to vector<16x128xf32>
    %28 = arith.mulf %27, %26 : vector<16x128xf32>
    %29 = arith.mulf %28, %4 : vector<16x128xf32>
    %30 = arith.mulf %29, %12 : vector<16x128xf32>
    %31 = arith.mulf %24, %24 : vector<16x128xf32>
    %cst_10 = arith.constant 1.000000e-01 : f32
    %32 = vector.broadcast %cst_10 : f32 to vector<16x128xf32>
    %33 = arith.mulf %32, %31 : vector<16x128xf32>
    %cst_11 = arith.constant 1.000000e+00 : f32
    %34 = vector.broadcast %cst_11 : f32 to vector<16x128xf32>
    %35 = arith.subf %34, %4 : vector<16x128xf32>
    %36 = arith.mulf %33, %35 : vector<16x128xf32>
    %37 = arith.mulf %36, %17 : vector<16x128xf32>
    %38 = arith.subf %30, %37 : vector<16x128xf32>
    %c1_i32 = arith.constant 1 : i32
    %39 = arith.muli %arg0, %c1_i32 : i32
    %40 = arith.addi %39, %arg1 : i32
    %c2048_i32 = arith.constant 2048 : i32
    %41 = arith.muli %40, %c2048_i32 : i32
    %c2048_i32_12 = arith.constant 2048 : i32
    %42 = arith.subi %c2048_i32_12, %41 : i32
    %c2048_i32_13 = arith.constant 2048 : i32
    %43 = arith.cmpi sge, %42, %c2048_i32_13 : i32
    %44 = arith.extui %43 : i1 to i32
    %c0_i32_14 = arith.constant 0 : i32
    %45 = arith.cmpi ne, %44, %c0_i32_14 : i32
    scf.if %45 {
      %c0_19 = arith.constant 0 : index
      %c0_20 = arith.constant 0 : index
      %52 = vector.load %arg5[%c0_19, %c0_20] : memref<8x128xf32, #tpu.memory_space<vmem>>, vector<8x128xf32>
      %53 = vector.shape_cast %38 : vector<16x128xf32> to vector<2x8x128xf32>
      %cst_21 = arith.constant dense<0.000000e+00> : vector<8x128xf32>
      %54 = vector.multi_reduction <add>, %53, %cst_21 [0] : vector<2x8x128xf32> to vector<8x128xf32>
      %55 = arith.addf %52, %54 : vector<8x128xf32>
      %c0_22 = arith.constant 0 : index
      %c0_23 = arith.constant 0 : index
      %56 = vector.load %arg5[%c0_22, %c0_23] : memref<8x128xf32, #tpu.memory_space<vmem>>, vector<8x128xf32>
      tpu.vector_store %arg5[%c0_22, %c0_23], %55 {strides = array<i32>} : memref<8x128xf32, #tpu.memory_space<vmem>>, vector<8x128xf32>,
    } else {
    }
    %c2048_i32_15 = arith.constant 2048 : i32
    %46 = arith.cmpi slt, %42, %c2048_i32_15 : i32
    %47 = arith.extui %46 : i1 to i32
    %c0_i32_16 = arith.constant 0 : i32
    %48 = arith.cmpi ne, %47, %c0_i32_16 : i32
    scf.if %48 {
      %52 = tpu.iota {dimensions = array<i32: 0>} : vector<16x128xi32>
      %53 = tpu.iota {dimensions = array<i32: 1>} : vector<16x128xi32>
      %c128_i32 = arith.constant 128 : i32
      %54 = vector.broadcast %c128_i32 : i32 to vector<16x128xi32>
      %55 = arith.muli %52, %54 : vector<16x128xi32>
      %56 = arith.addi %55, %53 : vector<16x128xi32>
      %57 = vector.broadcast %42 : i32 to vector<16x128xi32>
      %58 = arith.cmpi slt, %56, %57 : vector<16x128xi32>
      %c0_19 = arith.constant 0 : index
      %c0_20 = arith.constant 0 : index
      %59 = vector.load %arg5[%c0_19, %c0_20] : memref<8x128xf32, #tpu.memory_space<vmem>>, vector<8x128xf32>
      %cst_21 = arith.constant 0.000000e+00 : f32
      %60 = vector.broadcast %cst_21 : f32 to vector<16x128xf32>
      %61 = arith.select %58, %38, %60 : vector<16x128xi1>, vector<16x128xf32>
      %62 = vector.shape_cast %61 : vector<16x128xf32> to vector<2x8x128xf32>
      %cst_22 = arith.constant dense<0.000000e+00> : vector<8x128xf32>
      %63 = vector.multi_reduction <add>, %62, %cst_22 [0] : vector<2x8x128xf32> to vector<8x128xf32>
      %64 = arith.addf %59, %63 : vector<8x128xf32>
      %c0_23 = arith.constant 0 : index
      %c0_24 = arith.constant 0 : index
      %65 = vector.load %arg5[%c0_23, %c0_24] : memref<8x128xf32, #tpu.memory_space<vmem>>, vector<8x128xf32>
      tpu.vector_store %arg5[%c0_23, %c0_24], %64 {strides = array<i32>} : memref<8x128xf32, #tpu.memory_space<vmem>>, vector<8x128xf32>,
    } else {
    }
    %c0_i32_17 = arith.constant 0 : i32
    %49 = arith.cmpi eq, %arg1, %c0_i32_17 : i32
    %50 = arith.extui %49 : i1 to i32
    %c0_i32_18 = arith.constant 0 : i32
    %51 = arith.cmpi ne, %50, %c0_i32_18 : i32
    scf.if %51 {
      %c0_19 = arith.constant 0 : index
      %c0_20 = arith.constant 0 : index
      %52 = vector.load %arg5[%c0_19, %c0_20] : memref<8x128xf32, #tpu.memory_space<vmem>>, vector<8x128xf32>
      %c0_21 = arith.constant 0 : index
      %c0_22 = arith.constant 0 : index
      %c0_23 = arith.constant 0 : index
      %53 = vector.load %arg4[%c0_21, %c0_22, %c0_23] : memref<1x8x128xf32, #tpu.memory_space<vmem>>, vector<1x8x128xf32>
      %54 = vector.shape_cast %53 : vector<1x8x128xf32> to vector<8x128xf32>
      %55 = vector.shape_cast %52 : vector<8x128xf32> to vector<1x8x128xf32>
      tpu.vector_store %arg4[%c0_21, %c0_22, %c0_23], %55 {strides = array<i32>} : memref<1x8x128xf32, #tpu.memory_space<vmem>>, vector<1x8x128xf32>,
    } else {
    }
    return
  }
  func.func @transform_0(%arg0: i32, %arg1: i32) -> (i32, i32) {
    %c1_i32 = arith.constant 1 : i32
    %0 = arith.muli %arg0, %c1_i32 : i32
    %1 = arith.addi %0, %arg1 : i32
    %c0_i32 = arith.constant 0 : i32
    %2 = arith.minsi %1, %c0_i32 : i32
    %c0_i32_0 = arith.constant 0 : i32
    %c0_i32_1 = arith.constant 0 : i32
    return %2, %c0_i32_0 : i32, i32
  }
  func.func @transform_1(%arg0: i32, %arg1: i32) -> (i32, i32) {
    %c1_i32 = arith.constant 1 : i32
    %0 = arith.muli %arg0, %c1_i32 : i32
    %1 = arith.addi %0, %arg1 : i32
    %c0_i32 = arith.constant 0 : i32
    %2 = arith.minsi %1, %c0_i32 : i32
    %c0_i32_0 = arith.constant 0 : i32
    %c0_i32_1 = arith.constant 0 : i32
    return %2, %c0_i32_0 : i32, i32
  }
  func.func @transform_2(%arg0: i32, %arg1: i32) -> (i32, i32, i32) {
    %c0_i32 = arith.constant 0 : i32
    %c0_i32_0 = arith.constant 0 : i32
    %c0_i32_1 = arith.constant 0 : i32
    return %arg0, %c0_i32, %c0_i32_0 : i32, i32, i32
  }
}

</mosaic_0001>

<bundles_post_ra>
// kernel: bce_focal_loss.1
= control target key start
LH: loop header
LB: loop body
LE: loop exit
PB: predicated region body
PF: predicated region fallthrough
CT: control target
= control target key end

     0   :  { %s256_s0 = inlined_call_operand.vmem [shape: f32[16,128], index: 0, kind: input, shape index: {}]   ;;  %s257_s1 = inlined_call_operand.vmem [shape: f32[16,128], index: 1, kind: input, shape index: {}]   ;;  %s258_s2 = inlined_call_operand.vmem [shape: f32[1,8,128], index: 2, kind: output, shape index: {}]  }
   0x1   :  { %v80_v0 = vld [vmem:[%s256_s0] sm:$0xff]  ;;  %v239_v1 = vld [vmem:[%s256_s0 + $0x8] sm:$0xff] }
   0x2   :  { %v84_v2 = vand.u32 2147483647, %v80_v0  ;;  %v85_v3 = vand.u32 2147483647, %v239_v1  ;;  %v114_v19 = vsub.f32 0.0, %v80_v0  ;;  %v115_v20 = vsub.f32 0.0, %v239_v1 }
   0x3   :  { %v82_v22 = vld [vmem:[%s257_s1] sm:$0xff]  ;;  %vm126_vm0 = vcmp.ge.f32.partialorder %v80_v0, 0.0  ;;  %v110_v29 = vmin.f32 %v80_v0, 0.0  ;;  %v111_v30 = vmin.f32 %v239_v1, 0.0  ;;  %vm127_vm3 = vcmp.ge.f32.partialorder %v239_v1, 0.0  ;;  %v83_v32 = vld [vmem:[%s257_s1 + $0x8] sm:$0xff] }
   0x4   :  { %v86_v4 = vsub.f32 0.0, %v84_v2  ;;  %v87_v5 = vsub.f32 0.0, %v85_v3  ;;  %v116_v33 = vmin.f32 %v114_v19, 0.0  ;;  %v117_v34 = vmin.f32 %v115_v20, 0.0 }
   0x5   :  { %v144_v36 = vsub.f32 1.0, %v82_v22  ;;  %v145_v47 = vsub.f32 1.0, %v83_v32 }
   0x6   :  { %v88_v6 = vmul.f32 1.442695, %v86_v4  ;;  %v90_v7 = vmul.f32 1.442695, %v87_v5 }
   0x8   :  { %206 = vpow2.f32 %v88_v6 }
   0x9   :  { %208 = vpow2.f32 %v90_v7 }
   0xe   :  { %v207_v8 = vpop.eup %206 }
   0xf   :  { %v209_v9 = vpop.eup %208  ;;  %v92_v10 = vadd.f32 1.0, %v207_v8  ;;  %v95_v11 = vmul.f32 -0.5, %v207_v8  ;;  %v98_v16 = vand.u32 2147483647, %v207_v8 }
  0x10   :  { %v101_v12 = vadd.f32 1.0, %v209_v9  ;;  %v104_v13 = vmul.f32 -0.5, %v209_v9  ;;  %v107_v17 = vand.u32 2147483647, %v209_v9 }
  0x11   :  { %210 = vlog2.f32 %v92_v10  ;;  %v96_v14 = vadd.f32 1.0, %v95_v11  ;;  %vm99_vm1 = vcmp.lt.f32.partialorder %v98_v16, 0.0004427343 }
  0x12   :  { %212 = vlog2.f32 %v101_v12  ;;  %v105_v15 = vadd.f32 1.0, %v104_v13  ;;  %vm108_vm2 = vcmp.lt.f32.partialorder %v107_v17, 0.0004427343 }
  0x13   :  { %214 = vrcp.f32 %v92_v10  ;;  %v97_v24 = vmul.f32 %v207_v8, %v96_v14 }
  0x14   :  { %216 = vrcp.f32 %v101_v12  ;;  %v106_v25 = vmul.f32 %v209_v9, %v105_v15 }
  0x17   :  { %v211_v18 = vpop.eup %210 }
  0x18   :  { %v213_v21 = vpop.eup %212  ;;  %v94_v23 = vmul.f32 0.6931472, %v211_v18 }
  0x19   :  { %v215_v26 = vpop.eup %214  ;;  %v103_v27 = vmul.f32 0.6931472, %v213_v21 }
  0x1a   :  { %v217_v28 = vpop.eup %216  ;;  %v124_v31 = vmul.f32 %v215_v26, %v207_v8  ;;  %v100_v37 = vsel %vm99_vm1, %v97_v24, %v94_v23 }
  0x1b   :  { %v125_v35 = vmul.f32 %v217_v28, %v209_v9  ;;  %v109_v38 = vsel %vm108_vm2, %v106_v25, %v103_v27  ;;  %v112_v48 = vsub.f32 %v110_v29, %v100_v37  ;;  %v118_v49 = vsub.f32 %v116_v33, %v100_v37 }
  0x1c   :  { %v128_v39 = vsel %vm126_vm0, %v215_v26, %v124_v31  ;;  %v130_v40 = vsel %vm126_vm0, %v124_v31, %v215_v26  ;;  %v113_v52 = vsub.f32 %v111_v30, %v109_v38  ;;  %v119_v53 = vsub.f32 %v117_v34, %v109_v38 }
  0x1d   :  { %v129_v41 = vsel %vm127_vm3, %v217_v28, %v125_v35  ;;  %v131_v42 = vsel %vm127_vm3, %v125_v35, %v217_v28  ;;  %v132_v43 = vmul.f32 %v130_v40, %v130_v40  ;;  %v140_v44 = vmul.f32 %v128_v39, %v128_v39 }
  0x1e   :  { %v133_v45 = vmul.f32 %v131_v42, %v131_v42  ;;  %v141_v46 = vmul.f32 %v129_v41, %v129_v41 }
  0x1f   :  { %v134_v50 = vmul.f32 -0.9, %v132_v43  ;;  %v142_v51 = vmul.f32 0.1, %v140_v44 }
  0x20   :  { %v135_v54 = vmul.f32 -0.9, %v133_v45  ;;  %v143_v55 = vmul.f32 0.1, %v141_v46 }
  0x21   :  { %v136_v56 = vmul.f32 %v134_v50, %v82_v22  ;;  %v146_v57 = vmul.f32 %v144_v36, %v142_v51 }
  0x22   :  { %v137_v58 = vmul.f32 %v135_v54, %v83_v32  ;;  %v147_v59 = vmul.f32 %v145_v47, %v143_v55 }
  0x23   :  { %v138_v60 = vmul.f32 %v136_v56, %v112_v48  ;;  %v148_v61 = vmul.f32 %v146_v57, %v118_v49 }
  0x24   :  { %v139_v62 = vmul.f32 %v137_v58, %v113_v52  ;;  %v149_v63 = vmul.f32 %v147_v59, %v119_v53 }
  0x25   :  { %v150_v0 = vsub.f32 %v138_v60, %v148_v61 }
  0x26   :  { %v151_v1 = vsub.f32 %v139_v62, %v149_v63 }
  0x28   :  { %v160_v2 = vadd.f32 %v151_v1, %v150_v0 }
  0x2a   :  { %189 = vst [vmem:[%s258_s2] sm:$0xff] %v160_v2 }

</bundles_post_ra>
